<compile_context>
chip_gen: v6e
topology: v6e:2x2x1
jax: 0.10.0
libtpu: 0.0.40
codegen_flags: <defaults>
</compile_context>

<pallas_src>
import jax
import jax.numpy as jnp
from jax.experimental import pallas as pl
from jax.experimental.pallas import tpu as pltpu

LANES = 128
MAX_ROW_TILE = 4096  # 4096 rows * 128 lanes * 4 B = 2 MiB per f32 block


def _quant_kernel(x_ref, o_ref):
    x = x_ref[...]
    y = jnp.round((x + 1.0) * 127.5) / 127.5 - 1.0
    o_ref[...] = y.astype(o_ref.dtype)


def quantization(x: jax.Array) -> jax.Array:
    """Elementwise fake-quantization, equivalent to Quantization.forward."""
    orig_shape = x.shape
    orig_dtype = x.dtype
    n = x.size

    if n % LANES == 0:
        # Fast path: lane-dense reshape is a free bitcast, no extra HBM pass.
        rows = n // LANES
        x2d = x.reshape(rows, LANES)
        padded = False
    else:
        # TODO(synk): sizes not divisible by 128 pay one pad copy + one slice.
        rows = pl.cdiv(n, LANES)
        flat = jnp.pad(x.reshape(-1), (0, rows * LANES - n))
        x2d = flat.reshape(rows, LANES)
        padded = True

    # Full-dim block when small (always legal), else ~2 MiB tiles with a
    # ragged last block handled by Pallas.
    block_rows = rows if rows <= MAX_ROW_TILE else MAX_ROW_TILE
    grid = (pl.cdiv(rows, block_rows),)

    out2d = pl.pallas_call(
        _quant_kernel,
        out_shape=jax.ShapeDtypeStruct((rows, LANES), orig_dtype),
        grid_spec=pltpu.PrefetchScalarGridSpec(
            num_scalar_prefetch=0,
            grid=grid,
            in_specs=[pl.BlockSpec((block_rows, LANES), lambda i: (i, 0))],
            out_specs=pl.BlockSpec((block_rows, LANES), lambda i: (i, 0)),
        ),
        compiler_params=pltpu.CompilerParams(
            dimension_semantics=("parallel",),
            vmem_limit_bytes=32 * 1024 * 1024,
        ),
    )(x2d)

    if padded:
        return out2d.reshape(-1)[:n].reshape(orig_shape)
    return out2d.reshape(orig_shape)


def quantization_ref(x: jax.Array) -> jax.Array:
    """Pure-JAX reference for validation."""
    return jnp.round((x + 1.0) * 127.5) / 127.5 - 1.0


if __name__ == "__main__":
    key = jax.random.PRNGKey(0)

    # Primary test: small NCHW input (divisible-by-128 fast path).
    x = jax.random.uniform(key, (2, 4, 16, 16), dtype=jnp.float32,
                           minval=-1.0, maxval=1.0)
    out = jax.block_until_ready(quantization(x))
    ref = quantization_ref(x)
    assert out.shape == x.shape
    assert out.dtype == x.dtype
    assert jnp.allclose(out, ref, atol=1e-6), "mismatch vs reference (fast path)"

    # Secondary test: total size not divisible by 128 (fallback path).
    x2 = jax.random.uniform(jax.random.PRNGKey(1), (3, 5, 7, 11),
                            dtype=jnp.float32, minval=-1.0, maxval=1.0)
    out2 = jax.block_until_ready(quantization(x2))
    ref2 = quantization_ref(x2)
    assert out2.shape == x2.shape
    assert jnp.allclose(out2, ref2, atol=1e-6), "mismatch vs reference (ragged path)"

    print("KERNEL_OK")
</pallas_src>

<mosaic_0001>
module attributes {stable_mosaic.version = 11 : i64} {
  func.func @_quant_kernel(%arg0: i32, %arg1: memref<16x128xf32, #tpu.memory_space<vmem>>, %arg2: memref<16x128xf32, #tpu.memory_space<vmem>>) attributes {dimension_semantics = [#tpu.dimension_semantics<parallel>], iteration_bounds = array<i64: 1>, scalar_prefetch = 0 : i64, scratch_operands = 0 : i64, tpu.core_type = #tpu.core_type<tc>, window_params = [{transform_indices = @transform_0, window_bounds = array<i64: 16, 128>}, {transform_indices = @transform_1, window_bounds = array<i64: 16, 128>}]} {
    %c0 = arith.constant 0 : index
    %c0_0 = arith.constant 0 : index
    %0 = vector.load %arg1[%c0, %c0_0] : memref<16x128xf32, #tpu.memory_space<vmem>>, vector<16x128xf32>
    %cst = arith.constant 1.000000e+00 : f32
    %1 = vector.broadcast %cst : f32 to vector<16x128xf32>
    %2 = arith.addf %0, %1 : vector<16x128xf32>
    %cst_1 = arith.constant 1.275000e+02 : f32
    %3 = vector.broadcast %cst_1 : f32 to vector<16x128xf32>
    %4 = arith.mulf %2, %3 : vector<16x128xf32>
    %5 = math.roundeven %4 : vector<16x128xf32>
    %cst_2 = arith.constant 1.275000e+02 : f32
    %6 = vector.broadcast %cst_2 : f32 to vector<16x128xf32>
    %7 = arith.divf %5, %6 : vector<16x128xf32>
    %cst_3 = arith.constant 1.000000e+00 : f32
    %8 = vector.broadcast %cst_3 : f32 to vector<16x128xf32>
    %9 = arith.subf %7, %8 : vector<16x128xf32>
    %c0_4 = arith.constant 0 : index
    %c0_5 = arith.constant 0 : index
    %10 = vector.load %arg2[%c0_4, %c0_5] : memref<16x128xf32, #tpu.memory_space<vmem>>, vector<16x128xf32>
    tpu.vector_store %arg2[%c0_4, %c0_5], %9 {strides = array<i32>} : memref<16x128xf32, #tpu.memory_space<vmem>>, vector<16x128xf32>,
    return
  }
  func.func @transform_0(%arg0: i32) -> (i32, i32) {
    %c0_i32 = arith.constant 0 : i32
    %c0_i32_0 = arith.constant 0 : i32
    return %arg0, %c0_i32 : i32, i32
  }
  func.func @transform_1(%arg0: i32) -> (i32, i32) {
    %c0_i32 = arith.constant 0 : i32
    %c0_i32_0 = arith.constant 0 : i32
    return %arg0, %c0_i32 : i32, i32
  }
}

</mosaic_0001>

<bundles_post_ra>
// kernel: tpu_custom_call.1
= control target key start
LH: loop header
LB: loop body
LE: loop exit
PB: predicated region body
PF: predicated region fallthrough
CT: control target
= control target key end

     0   :  { %6 = vsyncpa [#allocation3], 0  ;;  %s147_s0 = inlined_call_operand.hbm [shape: f32[16,128], index: 0, kind: input, shape index: {}]   ;;  %s148_s1 = inlined_call_operand.hbm [shape: f32[16,128], index: 1, kind: output, shape index: {}]  }
   0x1   :  { %7 = vsyncpa [#allocation4], 0  ;;  %s121_s6 = smov [#allocation2]  }
   0x2   :  { %s13_s7 = sshll.u32 %s121_s6, 4  ;;  %s14_s7 = int_to_ptr.vmem [resolvable:$true] %s13_s7 }
   0x3   :  { %s85_s8 = scalar_lea.vmem %s14_s7, 256  ;;  %p90_p1 = scmp.lt.s32.totalorder %s14_s7, %s14_s7 }
   0x4   :  { %p86_p0 = scmp.ne.s32.totalorder %s14_s7, %s85_s8  ;;  %p91_p2 = scmp.lt.s32.totalorder %s85_s8, %s85_s8 }
   0x6   :  { %p92_p3 = por %p91_p2, %p90_p1 }
   0x8   :  { %p93_p4 = pnand %p92_p3, %p86_p0 }
   0xa   :  { %96 = shalt.err (!%p93_p4)
}
   0xb   :  { %s122_s9 = smov 128   ;;  %s123_s10 = smov 8  }
   0xc   :  { %19 = dma.hbm_to_vmem [thread:$0]  %s147_s0, 256, %s14_s7, [#allocation3], %s122_s9, %s122_s9, %s123_s10  }
   0xd   :  { %117 = dma.done.wait [#allocation3], 256  }
   0xe   :  { %118 = vsyncadd [#allocation3], 4294967040  ;;  %v23_v0 = vld [vmem:[#allocation2] sm:$0xff]  ;;  %v24_v1 = vld [vmem:[#allocation2 + $0x8] sm:$0xff]  ;;  %s124_s0 = smov [#allocation5]  }
   0xf   :  { %v25_v2 = vadd.f32 1.0, %v23_v0  ;;  %v26_v3 = vadd.f32 1.0, %v24_v1  ;;  %s43_s13 = sshll.u32 %s124_s0, 4  ;;  %s44_s13 = int_to_ptr.vmem [resolvable:$true] %s43_s13 }
  0x10   :  { %s97_s14 = scalar_lea.vmem %s44_s13, 256  ;;  %p102_p6 = scmp.lt.s32.totalorder %s44_s13, %s44_s13 }
  0x11   :  { %v27_v4 = vmul.f32 127.5, %v25_v2  ;;  %v28_v5 = vmul.f32 127.5, %v26_v3  ;;  %p98_p5 = scmp.ne.s32.totalorder %s44_s13, %s97_s14  ;;  %p103_p7 = scmp.lt.s32.totalorder %s97_s14, %s97_s14 }
  0x13   :  { %v59_v6 = vcvt.f32.s32 %v27_v4  ;;  %v57_v7 = vand.u32 2147483647, %v27_v4  ;;  %v67_v8 = vcvt.f32.s32 %v28_v5  ;;  %v62_v10 = vand.u32 2147483648, %v27_v4  ;;  %p104_p8 = por %p103_p7, %p102_p6 }
  0x14   :  { %v65_v11 = vand.u32 2147483647, %v28_v5  ;;  %v70_v13 = vand.u32 2147483648, %v28_v5 }
  0x15   :  { %v60_v9 = vcvt.s32.f32 %v59_v6  ;;  %v68_v12 = vcvt.s32.f32 %v67_v8  ;;  %vm58_vm0 = vcmp.lt.f32.partialorder %v57_v7, 8388608.0  ;;  %p105_p9 = pnand %p104_p8, %p98_p5 }
  0x16   :  { %vm66_vm1 = vcmp.lt.f32.partialorder %v65_v11, 8388608.0 }
  0x17   :  { %v61_v14 = vand.u32 2147483647, %v60_v9  ;;  %v69_v15 = vand.u32 2147483647, %v68_v12 }
  0x19   :  { %v63_v16 = vor.u32 %v62_v10, %v61_v14  ;;  %v71_v17 = vor.u32 %v70_v13, %v69_v15 }
  0x1b   :  { %v64_v18 = vsel %vm58_vm0, %v63_v16, %v27_v4  ;;  %v72_v20 = vsel %vm66_vm1, %v71_v17, %v28_v5 }
  0x1c   :  { %v32_v19 = vmul.f32 0.007843138, %v64_v18  ;;  %v33_v21 = vmul.f32 0.007843138, %v72_v20 }
  0x1e   :  { %v55_v22 = vadd.f32 -1.0, %v32_v19  ;;  %v56_v23 = vadd.f32 -1.0, %v33_v21 }
  0x20   :  { %36 = vst [vmem:[#allocation5] sm:$0xff] %v55_v22  ;;  %37 = vst [vmem:[#allocation5 + $0x8] sm:$0xff] %v56_v23 }
  0x21   :  { %108 = shalt.err (!%p105_p9)
}
  0x22   :  { %49 = dma.vmem_to_hbm [thread:$0]  %s44_s13, 256, %s148_s1, [#allocation4], %s122_s9, %s122_s9, %s123_s10  }
  0x23   :  { %119 = dma.done.wait [#allocation4], 256  }
  0x24   :  { %120 = vsyncadd [#allocation4], 4294967040 }
  0x25   :  { %53 = vsyncpa [#allocation3], 1 }
  0x26   :  { %54 = vsyncpa [#allocation4], 1 }

</bundles_post_ra>
